<compile_context>
chip_gen: v5e
topology: v5e:2x2
jax: 0.10.0
libtpu: 0.0.40
codegen_flags: <defaults>
</compile_context>

<pallas_src>
import jax
import jax.numpy as jnp
import numpy as np
from jax.experimental import pallas as pl
from jax.experimental.pallas import tpu as pltpu


def _cycle_balance_kernel(logits_ref, targets_ref, adj_ref, out_ref):
    # One grid step == one block of `Bt` batch elements.
    logits = logits_ref[...].astype(jnp.float32)      # [Bt, L, N]
    targets = targets_ref[...]                        # [Bt, L, 1] int32
    adj = adj_ref[...].astype(jnp.float32)            # [Bt, N, N]
    Bt, L, N = logits.shape

    iota_n = jax.lax.broadcasted_iota(jnp.int32, (Bt, L, N), 2)

    # ---- argmax over nodes, first-index tie-breaking (== torch.argmax) ----
    max_val = jnp.max(logits, axis=-1, keepdims=True)                     # [Bt, L, 1]
    idx = jnp.min(jnp.where(logits == max_val, iota_n, N),
                  axis=-1, keepdims=True)                                 # [Bt, L, 1]
    src_oh = (iota_n == idx).astype(jnp.float32)                          # [Bt, L, N]

    # ---- "next node" one-hot: dst[t] = src[t+1], zero at t = L-1 ----
    # Sublane roll on the XLU (shift = L-1 == -1 mod L) instead of a shift
    # matmul; the wrapped-around last time step is masked to zero.
    dst_oh = pltpu.roll(src_oh, shift=L - 1, axis=1)                      # [Bt, L, N]
    iota_t = jax.lax.broadcasted_iota(jnp.int32, (Bt, L, N), 1)
    dst_oh = jnp.where(iota_t == L - 1, 0.0, dst_oh)

    # ---- balance term: |sum_t adj[src_t, dst_t]| summed over the block ----
    # Exact pair-count matmul: C[s, d] = #{t : src_t == s and dst_t == d}.
    # Both MXU operands are exact 0/1 in bf16 (lossless); the real-valued
    # adjacency only touches the VPU in f32.
    src_bf = src_oh.astype(jnp.bfloat16)
    dst_bf = dst_oh.astype(jnp.bfloat16)
    bal_sum = jnp.float32(0.0)
    for b in range(Bt):  # trace-time unroll; same MXU work as a batched einsum
        pair_count = jax.lax.dot_general(
            src_bf[b], dst_bf[b],
            dimension_numbers=(((0,), (0,)), ((), ())),   # contract over time
            preferred_element_type=jnp.float32)           # [N, N] f32
        bal_sum = bal_sum + jnp.abs(jnp.sum(pair_count * adj[b]))

    # ---- cross-entropy partial sum over the Bt * L positions of this block ----
    lse = (jnp.log(jnp.sum(jnp.exp(logits - max_val), axis=-1, keepdims=True))
           + max_val)                                                     # [Bt, L, 1]
    tgt_logit = jnp.sum(jnp.where(iota_n == targets, logits, 0.0),
                        axis=-1, keepdims=True)                           # [Bt, L, 1]
    ce_sum = jnp.sum(lse - tgt_logit)

    out_ref[0, 0] = bal_sum
    out_ref[0, 1] = ce_sum


def _pick_block_b(B, max_block=8):
    """Largest divisor of B that is <= max_block (uniform batch blocks)."""
    bt = min(B, max_block)
    while B % bt:
        bt -= 1
    return bt


def cycle_balance_loss(path_logits, target_paths, adj_matrix, alpha=0.7,
                       block_b=None):
    """Pallas implementation of CycleBalanceLoss.forward."""
    B, L, N = path_logits.shape
    if block_b is None:
        block_b = _pick_block_b(B)
    assert B % block_b == 0, (B, block_b)
    num_blocks = B // block_b
    targets3 = target_paths.astype(jnp.int32)[:, :, None]                 # [B, L, 1]

    partials = pl.pallas_call(
        _cycle_balance_kernel,
        grid=(num_blocks,),
        in_specs=[
            pl.BlockSpec((block_b, L, N), lambda b: (b, 0, 0)),   # logits (native dtype)
            pl.BlockSpec((block_b, L, 1), lambda b: (b, 0, 0)),   # target indices (int32)
            pl.BlockSpec((block_b, N, N), lambda b: (b, 0, 0)),   # adjacency (native dtype)
        ],
        out_specs=pl.BlockSpec((1, 2), lambda b: (b, 0), memory_space=pltpu.SMEM),
        out_shape=jax.ShapeDtypeStruct((num_blocks, 2), jnp.float32),
        compiler_params=pltpu.CompilerParams(
            dimension_semantics=("parallel",),   # batch-block axis -> both TCs on v7x
            vmem_limit_bytes=32 * 1024 * 1024,   # safe on v5e (16 MiB default) and v7x
        ),
    )(path_logits, targets3, adj_matrix)

    # Tiny final reduction + alpha blend in plain JAX.
    balance_loss = jnp.sum(partials[:, 0]) / B           # mean_b |sum_t weights|
    seq_loss = jnp.sum(partials[:, 1]) / (B * L)          # mean CE over all positions
    return alpha * balance_loss + (1.0 - alpha) * seq_loss


def _reference_loss(path_logits, target_paths, adj_matrix, alpha=0.7):
    """Pure-JAX reference mirroring the PyTorch module (for validation)."""
    B, L, N = path_logits.shape
    idx = jnp.argmax(path_logits, axis=-1)                                # [B, L]
    src, dst = idx[:, :-1], idx[:, 1:]
    b_ix = jnp.arange(B)[:, None]
    weights = adj_matrix[b_ix, src, dst]                                  # [B, L-1]
    balance = jnp.mean(jnp.abs(jnp.sum(weights, axis=1)))
    lse = jax.nn.logsumexp(path_logits, axis=-1)                          # [B, L]
    tgt_logit = jnp.take_along_axis(path_logits, target_paths[..., None], axis=-1)[..., 0]
    ce = jnp.mean(lse - tgt_logit)
    return alpha * balance + (1 - alpha) * ce


if __name__ == "__main__":
    B, L, N = 2, 8, 16
    alpha = 0.7

    key = jax.random.PRNGKey(0)
    k1, k2, k3 = jax.random.split(key, 3)
    path_logits = jax.random.normal(k1, (B, L, N), dtype=jnp.float32)
    target_paths = jax.random.randint(k2, (B, L), 0, N, dtype=jnp.int32)
    adj_matrix = jax.random.normal(k3, (B, N, N), dtype=jnp.float32)

    loss = cycle_balance_loss(path_logits, target_paths, adj_matrix, alpha=alpha)
    loss = jax.block_until_ready(loss)

    ref = _reference_loss(path_logits, target_paths, adj_matrix, alpha=alpha)
    assert np.allclose(np.asarray(loss), np.asarray(ref), rtol=1e-5, atol=1e-5), (
        f"mismatch: pallas={loss} ref={ref}"
    )
    print("KERNEL_OK")
</pallas_src>

<mosaic_0001>
module attributes {stable_mosaic.version = 11 : i64} {
  func.func @_cycle_balance_kernel(%arg0: i32, %arg1: memref<2x8x16xf32, #tpu.memory_space<vmem>>, %arg2: memref<2x8x1xi32, #tpu.memory_space<vmem>>, %arg3: memref<2x16x16xf32, #tpu.memory_space<vmem>>, %arg4: memref<1x2xf32, #tpu.memory_space<smem>>) attributes {dimension_semantics = [#tpu.dimension_semantics<parallel>], iteration_bounds = array<i64: 1>, scalar_prefetch = 0 : i64, scratch_operands = 0 : i64, tpu.core_type = #tpu.core_type<tc>, window_params = [{transform_indices = @transform_0, window_bounds = array<i64: 2, 8, 16>}, {transform_indices = @transform_1, window_bounds = array<i64: 2, 8, 1>}, {transform_indices = @transform_2, window_bounds = array<i64: 2, 16, 16>}, {transform_indices = @transform_3, window_bounds = array<i64: 1, 2>}]} {
    %c0 = arith.constant 0 : index
    %c0_0 = arith.constant 0 : index
    %c0_1 = arith.constant 0 : index
    %0 = vector.load %arg1[%c0, %c0_0, %c0_1] : memref<2x8x16xf32, #tpu.memory_space<vmem>>, vector<2x8x16xf32>
    %c0_2 = arith.constant 0 : index
    %c0_3 = arith.constant 0 : index
    %c0_4 = arith.constant 0 : index
    %1 = vector.load %arg2[%c0_2, %c0_3, %c0_4] : memref<2x8x1xi32, #tpu.memory_space<vmem>>, vector<2x8x1xi32>
    %c0_5 = arith.constant 0 : index
    %c0_6 = arith.constant 0 : index
    %c0_7 = arith.constant 0 : index
    %2 = vector.load %arg3[%c0_5, %c0_6, %c0_7] : memref<2x16x16xf32, #tpu.memory_space<vmem>>, vector<2x16x16xf32>
    %3 = tpu.iota {dimensions = array<i32: 2>} : vector<2x8x16xi32>
    %cst = arith.constant dense<0xFF800000> : vector<2x8xf32>
    %4 = vector.multi_reduction <maximumf>, %0, %cst [2] : vector<2x8x16xf32> to vector<2x8xf32>
    %5 = vector.shape_cast %4 : vector<2x8xf32> to vector<2x8x1xf32>
    %6 = vector.broadcast %5 : vector<2x8x1xf32> to vector<2x8x16xf32>
    %7 = arith.cmpf oeq, %0, %6 : vector<2x8x16xf32>
    %c16_i32 = arith.constant 16 : i32
    %8 = vector.broadcast %c16_i32 : i32 to vector<2x8x16xi32>
    %9 = arith.select %7, %3, %8 : vector<2x8x16xi1>, vector<2x8x16xi32>
    %cst_8 = arith.constant dense<2147483647> : vector<2x8xi32>
    %10 = vector.multi_reduction <minsi>, %9, %cst_8 [2] : vector<2x8x16xi32> to vector<2x8xi32>
    %11 = vector.shape_cast %10 : vector<2x8xi32> to vector<2x8x1xi32>
    %12 = vector.broadcast %11 : vector<2x8x1xi32> to vector<2x8x16xi32>
    %13 = arith.cmpi eq, %3, %12 : vector<2x8x16xi32>
    %14 = arith.extui %13 : vector<2x8x16xi1> to vector<2x8x16xi32>
    %15 = arith.sitofp %14 : vector<2x8x16xi32> to vector<2x8x16xf32>
    %c7_i32 = arith.constant 7 : i32
    %16 = tpu.dynamic_rotate %15 by %c7_i32 dim 1 : vector<2x8x16xf32>, i32 -> vector<2x8x16xf32>
    %17 = tpu.iota {dimensions = array<i32: 1>} : vector<2x8x16xi32>
    %c7_i32_9 = arith.constant 7 : i32
    %18 = vector.broadcast %c7_i32_9 : i32 to vector<2x8x16xi32>
    %19 = arith.cmpi eq, %17, %18 : vector<2x8x16xi32>
    %cst_10 = arith.constant 0.000000e+00 : f32
    %20 = vector.broadcast %cst_10 : f32 to vector<2x8x16xf32>
    %21 = arith.select %19, %20, %16 : vector<2x8x16xi1>, vector<2x8x16xf32>
    %22 = arith.truncf %15 : vector<2x8x16xf32> to vector<2x8x16xbf16>
    %23 = arith.truncf %21 : vector<2x8x16xf32> to vector<2x8x16xbf16>
    %24 = vector.extract_strided_slice %22 {offsets = [0, 0, 0], sizes = [1, 8, 16], strides = [1, 1, 1]} : vector<2x8x16xbf16> to vector<1x8x16xbf16>
    %25 = vector.shape_cast %24 : vector<1x8x16xbf16> to vector<8x16xbf16>
    %26 = vector.extract_strided_slice %23 {offsets = [0, 0, 0], sizes = [1, 8, 16], strides = [1, 1, 1]} : vector<2x8x16xbf16> to vector<1x8x16xbf16>
    %27 = vector.shape_cast %26 : vector<1x8x16xbf16> to vector<8x16xbf16>
    %cst_11 = arith.constant dense<0.000000e+00> : vector<16x16xf32>
    %28 = tpu.matmul %25, %27, %cst_11 {dimension_numbers = #tpu.dot_dimension_numbers<[0], [0], [1], [1], [0, 1, 1, 1], [], []>} : vector<8x16xbf16>, vector<8x16xbf16>, vector<16x16xf32> -> vector<16x16xf32>
    %29 = vector.extract_strided_slice %2 {offsets = [0, 0, 0], sizes = [1, 16, 16], strides = [1, 1, 1]} : vector<2x16x16xf32> to vector<1x16x16xf32>
    %30 = vector.shape_cast %29 : vector<1x16x16xf32> to vector<16x16xf32>
    %31 = arith.mulf %28, %30 : vector<16x16xf32>
    %32 = vector.shape_cast %31 : vector<16x16xf32> to vector<1x16x16xf32>
    %cst_12 = arith.constant dense<0.000000e+00> : vector<1xf32>
    %33 = vector.multi_reduction <add>, %32, %cst_12 [1, 2] : vector<1x16x16xf32> to vector<1xf32>
    %34 = vector.shape_cast %33 : vector<1xf32> to vector<1x1x1xf32>
    %35 = vector.extract %34[0, 0, 0] : f32 from vector<1x1x1xf32>
    %36 = math.absf %35 : f32
    %cst_13 = arith.constant 0.000000e+00 : f32
    %37 = arith.addf %cst_13, %36 : f32
    %38 = vector.extract_strided_slice %22 {offsets = [1, 0, 0], sizes = [1, 8, 16], strides = [1, 1, 1]} : vector<2x8x16xbf16> to vector<1x8x16xbf16>
    %39 = vector.shape_cast %38 : vector<1x8x16xbf16> to vector<8x16xbf16>
    %40 = vector.extract_strided_slice %23 {offsets = [1, 0, 0], sizes = [1, 8, 16], strides = [1, 1, 1]} : vector<2x8x16xbf16> to vector<1x8x16xbf16>
    %41 = vector.shape_cast %40 : vector<1x8x16xbf16> to vector<8x16xbf16>
    %cst_14 = arith.constant dense<0.000000e+00> : vector<16x16xf32>
    %42 = tpu.matmul %39, %41, %cst_14 {dimension_numbers = #tpu.dot_dimension_numbers<[0], [0], [1], [1], [0, 1, 1, 1], [], []>} : vector<8x16xbf16>, vector<8x16xbf16>, vector<16x16xf32> -> vector<16x16xf32>
    %43 = vector.extract_strided_slice %2 {offsets = [1, 0, 0], sizes = [1, 16, 16], strides = [1, 1, 1]} : vector<2x16x16xf32> to vector<1x16x16xf32>
    %44 = vector.shape_cast %43 : vector<1x16x16xf32> to vector<16x16xf32>
    %45 = arith.mulf %42, %44 : vector<16x16xf32>
    %46 = vector.shape_cast %45 : vector<16x16xf32> to vector<1x16x16xf32>
    %cst_15 = arith.constant dense<0.000000e+00> : vector<1xf32>
    %47 = vector.multi_reduction <add>, %46, %cst_15 [1, 2] : vector<1x16x16xf32> to vector<1xf32>
    %48 = vector.shape_cast %47 : vector<1xf32> to vector<1x1x1xf32>
    %49 = vector.extract %48[0, 0, 0] : f32 from vector<1x1x1xf32>
    %50 = math.absf %49 : f32
    %51 = arith.addf %37, %50 : f32
    %52 = vector.broadcast %5 : vector<2x8x1xf32> to vector<2x8x16xf32>
    %53 = arith.subf %0, %52 : vector<2x8x16xf32>
    %54 = math.exp %53 : vector<2x8x16xf32>
    %cst_16 = arith.constant dense<0.000000e+00> : vector<2x8xf32>
    %55 = vector.multi_reduction <add>, %54, %cst_16 [2] : vector<2x8x16xf32> to vector<2x8xf32>
    %56 = vector.shape_cast %55 : vector<2x8xf32> to vector<2x8x1xf32>
    %57 = math.log %56 : vector<2x8x1xf32>
    %58 = arith.addf %57, %5 : vector<2x8x1xf32>
    %59 = vector.broadcast %1 : vector<2x8x1xi32> to vector<2x8x16xi32>
    %60 = arith.cmpi eq, %3, %59 : vector<2x8x16xi32>
    %cst_17 = arith.constant 0.000000e+00 : f32
    %61 = vector.broadcast %cst_17 : f32 to vector<2x8x16xf32>
    %62 = arith.select %60, %0, %61 : vector<2x8x16xi1>, vector<2x8x16xf32>
    %cst_18 = arith.constant dense<0.000000e+00> : vector<2x8xf32>
    %63 = vector.multi_reduction <add>, %62, %cst_18 [2] : vector<2x8x16xf32> to vector<2x8xf32>
    %64 = vector.shape_cast %63 : vector<2x8xf32> to vector<2x8x1xf32>
    %65 = arith.subf %58, %64 : vector<2x8x1xf32>
    %66 = vector.shape_cast %65 : vector<2x8x1xf32> to vector<1x2x8x1xf32>
    %cst_19 = arith.constant dense<0.000000e+00> : vector<1xf32>
    %67 = vector.multi_reduction <add>, %66, %cst_19 [1, 2, 3] : vector<1x2x8x1xf32> to vector<1xf32>
    %68 = vector.shape_cast %67 : vector<1xf32> to vector<1x1x1x1xf32>
    %69 = vector.extract %68[0, 0, 0, 0] : f32 from vector<1x1x1x1xf32>
    %c0_20 = arith.constant 0 : index
    %c0_21 = arith.constant 0 : index
    %70 = memref.load %arg4[%c0_20, %c0_21] : memref<1x2xf32, #tpu.memory_space<smem>>
    memref.store %51, %arg4[%c0_20, %c0_21] : memref<1x2xf32, #tpu.memory_space<smem>>
    %c0_22 = arith.constant 0 : index
    %c1 = arith.constant 1 : index
    %71 = memref.load %arg4[%c0_22, %c1] : memref<1x2xf32, #tpu.memory_space<smem>>
    memref.store %69, %arg4[%c0_22, %c1] : memref<1x2xf32, #tpu.memory_space<smem>>
    return
  }
  func.func @transform_0(%arg0: i32) -> (i32, i32, i32) {
    %c0_i32 = arith.constant 0 : i32
    %c0_i32_0 = arith.constant 0 : i32
    %c0_i32_1 = arith.constant 0 : i32
    return %arg0, %c0_i32, %c0_i32_0 : i32, i32, i32
  }
  func.func @transform_1(%arg0: i32) -> (i32, i32, i32) {
    %c0_i32 = arith.constant 0 : i32
    %c0_i32_0 = arith.constant 0 : i32
    %c0_i32_1 = arith.constant 0 : i32
    return %arg0, %c0_i32, %c0_i32_0 : i32, i32, i32
  }
  func.func @transform_2(%arg0: i32) -> (i32, i32, i32) {
    %c0_i32 = arith.constant 0 : i32
    %c0_i32_0 = arith.constant 0 : i32
    %c0_i32_1 = arith.constant 0 : i32
    return %arg0, %c0_i32, %c0_i32_0 : i32, i32, i32
  }
  func.func @transform_3(%arg0: i32) -> (i32, i32) {
    %c0_i32 = arith.constant 0 : i32
    %c0_i32_0 = arith.constant 0 : i32
    return %arg0, %c0_i32 : i32, i32
  }
}

</mosaic_0001>

<bundles_post_ra>
// kernel: tpu_custom_call.1
= control target key start
LH: loop header
LB: loop body
LE: loop exit
PB: predicated region body
PF: predicated region fallthrough
CT: control target
= control target key end

     0   :  { %8 = vsyncpa [#allocation3], 0  ;;  %s438_s0 = inlined_call_operand.vmem [shape: f32[2,8,16], index: 0, kind: input, shape index: {}]   ;;  %s439_s1 = inlined_call_operand.vmem [shape: s32[2,8,1], index: 1, kind: input, shape index: {}]   ;;  %s440_s2 = inlined_call_operand.hbm [shape: f32[2,16,16], index: 2, kind: input, shape index: {}]   ;;  %s441_s3 = inlined_call_operand.hbm [shape: f32[1,2], index: 3, kind: output, shape index: {}]  }
   0x1   :  { %9 = vsyncpa [#allocation4], 0  ;;  %s18_s14 = sshll.u32 %s440_s2, 4  ;;  %s345_s15 = smov [#allocation2]   ;;  %s19_s14 = int_to_ptr.hbm [resolvable:$true] %s18_s14 }
   0x2   :  { %s20_s16 = sshll.u32 %s345_s15, 4  ;;  %s346_s17 = smov 128   ;;  %s21_s16 = int_to_ptr.vmem [resolvable:$true] %s20_s16 }
   0x3   :  { %s347_s18 = smov 8  }
   0x4   :  { %26 = dma.hbm_to_vmem [thread:$0]  %s19_s14, 512, %s21_s16, [#allocation3], %s346_s17, %s346_s17, %s347_s18  }
   0x5   :  { %341 = dma.done.wait [#allocation3], 512  }
   0x6   :  { %342 = vsyncadd [#allocation3], 4294966784  ;;  %vm42_vm0 = vcmask 130048   ;;  %v377_v0 = vld [vmem:[%s438_s0] sm:$0xff]  ;;  %v384_v2 = vld [vmem:[%s438_s0 + $0x8] sm:$0xff]  ;;  %v348_v4 = vmov 0   ;;  %v40_v5 = vlaneseq }
   0x7   :  { %v43_v1 = vsel %vm42_vm0, %v377_v0, -inf  ;;  %v46_v3 = vsel %vm42_vm0, %v384_v2, -inf  ;;  %294 = vset.pattern.permute.xlu1 %v348_v4  ;;  %295 = vset.pattern.permute.xlu2 %v348_v4  ;;  %v34_v17 = vld [vmem:[%s439_s1] sm:$0xff]  ;;  %v35_v30 = vld [vmem:[%s439_s1 + $0x8] sm:$0xff]  ;;  %v349_v42 = vmov 0.0   ;;  %vm120_vm7 = vcmask 1043456  }
   0x8   :  { %44 = vmax.xlane.f32.xlu0 %v43_v1  ;;  %v390_v6 = vand.u32 127, %v40_v5  ;;  %v92_v39 = vshrl.u32 %v40_v5, 7  ;;  %vm116_vm11 = vcmask 64512   ;;  %vm242_vm12 = vcmask 7168   ;;  %s264_s27 = sshll.u32 %s441_s3, 4  ;;  %s350_s6 = smov [#allocation5]   ;;  %s265_s27 = int_to_ptr.hbm [resolvable:$true] %s264_s27 }
   0xa   :  { %vm93_vm6 = vcmp.eq.s32.totalorder %v92_v39, 7 }
  0x10   :  { %47 = vmax.xlane.f32.xlu0 %v46_v3 }
  0x7b   :  { %v392_v7 = vpop.xlane.xlu0 %44 }
  0x7c   :  { %vm49_vm1 = vcmp.eq.f32.partialorder %v377_v0, %v392_v7  ;;  %v206_v31 = vsub.f32 %v377_v0, %v392_v7 }
  0x7d   :  { %v51_v8 = vsel %vm49_vm1, %v390_v6, 16 }
  0x7e   :  { %v53_v9 = vsel %vm42_vm0, %v51_v8, 2147483647  ;;  %v208_v32 = vmul.f32 1.442695, %v206_v31 }
  0x7f   :  { %v55_v10 = vshra.s32 %v53_v9, 16  ;;  %v54_v22 = vand.u32 65535, %v53_v9 }
  0x81   :  { %v57_v11 = vcvt.s32.f32 %v55_v10  ;;  %v56_v24 = vcvt.s32.f32 %v54_v22 }
  0x83   :  { %58 = vmin.xlane.f32.xlu1 %v57_v11  ;;  %v398_v12 = vpop.xlane.xlu0 %47 }
  0x84   :  { %vm50_vm2 = vcmp.eq.f32.partialorder %v384_v2, %v398_v12  ;;  %v207_v18 = vsub.f32 %v384_v2, %v398_v12 }
  0x85   :  { %v52_v13 = vsel %vm50_vm2, %v390_v6, 16 }
  0x86   :  { %v68_v14 = vsel %vm42_vm0, %v52_v13, 2147483647  ;;  %v210_v19 = vmul.f32 1.442695, %v207_v18  ;;  %v37_v13 = vld [vmem:[#allocation2 + $0x8] sm:$0xff] }
  0x87   :  { %v70_v15 = vshra.s32 %v68_v14, 16  ;;  %v69_v26 = vand.u32 65535, %v68_v14 }
  0x88   :  { %297 = vpow2.f32 %v210_v19 }
  0x89   :  { %v72_v16 = vcvt.s32.f32 %v70_v15  ;;  %v71_v28 = vcvt.s32.f32 %v69_v26  ;;  %299 = vpow2.f32 %v208_v32 }
  0x8b   :  { %73 = vmin.xlane.f32.xlu1 %v72_v16 }
  0x8e   :  { %v298_v20 = vpop.eup %297 }
  0x8f   :  { %v215_v21 = vsel %vm42_vm0, %v298_v20, 0.0  ;;  %v300_v33 = vpop.eup %299 }
  0x90   :  { %v212_v34 = vsel %vm42_vm0, %v300_v33, 0.0 }
  0xa4   :  { %225 = vperm.xlu1 %294, %v34_v17  }
  0xce   :  { %216 = vadd.xlane.f32.xlu1 %v215_v21 }
  0xf6   :  { %v59_v23 = vpop.xlane.xlu1 %58 }
  0xf7   :  { %vm60_vm3 = vcmp.eq.f32.partialorder %v57_v11, %v59_v23  ;;  %v65_v35 = vcvt.f32.s32 %v59_v23  ;;  %v36_v11 = vld [vmem:[#allocation2] sm:$0xff]  ;;  %v38_v23 = vld [vmem:[#allocation2 + $0x10] sm:$0xff] }
  0xf8   :  { %v61_v25 = vsel %vm60_vm3, %v56_v24, inf }
  0xf9   :  { %62 = vmin.xlane.f32.xlu2 %v61_v25  ;;  %v66_v37 = vshll.u32 %v65_v35, 16 }
  0xfe   :  { %v74_v27 = vpop.xlane.xlu1 %73 }
  0xff   :  { %vm75_vm4 = vcmp.eq.f32.partialorder %v72_v16, %v74_v27  ;;  %v80_v41 = vcvt.f32.s32 %v74_v27  ;;  %v39_v27 = vld [vmem:[#allocation2 + $0x18] sm:$0xff] }
 0x100   :  { %v76_v29 = vsel %vm75_vm4, %v71_v28, inf }
 0x101   :  { %77 = vmin.xlane.f32.xlu2 %v76_v29  ;;  %v81_v46 = vshll.u32 %v80_v41, 16 }
 0x116   :  { %v226_v62 = vpop.permute.xlu1 %225 }
 0x117   :  { %vm230_vm10 = vcmp.eq.s32.totalorder %v390_v6, %v226_v62 }
 0x118   :  { %v232_v63 = vsel %vm230_vm10, %v377_v0, 0.0 }
 0x119   :  { %228 = vperm.xlu2 %295, %v35_v30   ;;  %v234_v1 = vsel %vm42_vm0, %v232_v63, 0.0 }
 0x141   :  { %v217_v8 = vpop.xlane.xlu1 %216 }
 0x142   :  { %213 = vadd.xlane.f32.xlu2 %v212_v34 }
 0x16c   :  { %v63_v36 = vpop.xlane.xlu2 %62 }
 0x16d   :  { %v64_v38 = vcvt.f32.s32 %v63_v36 }
 0x16f   :  { %v67_v40 = vadd.s32 %v66_v37, %v64_v38 }
 0x171   :  { %vm83_vm5 = vcmp.eq.s32.totalorder %v390_v6, %v67_v40 }
 0x172   :  { %v275_v43 = vsel %vm83_vm5, 1.0, %v349_v42 }
 0x173   :  { %v89_v44 = vrot.slane %v275_v43, 1  ;;  %v96_v53 = vpack.c.bf16 %v275_v43, %v275_v43 }
 0x174   :  { %v78_v45 = vpop.xlane.xlu2 %77 }
 0x175   :  { %v79_v47 = vcvt.f32.s32 %v78_v45  ;;  %v94_v48 = vsel %vm93_vm6, 0.0, %v89_v44 }
 0x176   :  { %v98_v49 = vpack.c.bf16 %v94_v48, %v94_v48 }
 0x177   :  { %v82_v50 = vadd.s32 %v81_v46, %v79_v47 }
 0x178   :  { %v122_v51 = vsel %vm120_vm7, %v98_v49, 0 }
 0x179   :  { %vm84_vm8 = vcmp.eq.s32.totalorder %v390_v6, %v82_v50  ;;  %131 = vmatpush.bf16.msra.mxu0 %v122_v51 }
 0x17a   :  { %v276_v52 = vsel %vm84_vm8, 1.0, %v349_v42 }
 0x17b   :  { %v97_v54 = vpack.c.bf16 %v276_v52, %v276_v52  ;;  %v90_v55 = vrot.slane %v276_v52, 1 }
 0x17c   :  { %v229_v56 = vpop.permute.xlu2 %228 }
 0x17d   :  { %vm231_vm9 = vcmp.eq.s32.totalorder %v390_v6, %v229_v56  ;;  %291 = vxpose.binary.xlu0.c.b16.start.end [1/2] (short) (narrow) %v97_v54, %v96_v53, 16  ;;  %v95_v57 = vsel %vm93_vm6, 0.0, %v90_v55 }
 0x17e   :  { %v233_v58 = vsel %vm231_vm9, %v384_v2, 0.0  ;;  %v99_v59 = vpack.c.bf16 %v95_v57, %v95_v57 }
 0x17f   :  { %v237_v60 = vsel %vm42_vm0, %v233_v58, 0.0 }
 0x180   :  { %238 = vadd.xlane.f32.xlu2 %v237_v60  ;;  %v174_v61 = vsel %vm120_vm7, %v99_v59, 0 }
 0x181   :  { %183 = vmatpush.bf16.msra.mxu1 %v174_v61 }
 0x1b5   :  { %v214_v5 = vpop.xlane.xlu2 %213 }
 0x1b6   :  { %301 = vlog2.f32 %v214_v5 }
 0x1b7   :  { %303 = vlog2.f32 %v217_v8 }
 0x1bc   :  { %v302_v10 = vpop.eup %301 }
 0x1bd   :  { %v219_v6 = vmul.f32 0.6931472, %v302_v10 }
 0x1bf   :  { %v222_v19 = vadd.f32 %v219_v6, %v392_v7 }
 0x1e4   :  { %296 = vset.pattern.permute.xlu0 %v348_v4  ;;  %v304_v4 = vpop.eup %303 }
 0x1e5   :  { %v221_v16 = vmul.f32 0.6931472, %v304_v4 }
 0x1e7   :  { %v223_v25 = vadd.f32 %v221_v16, %v398_v12 }
 0x1ee   :  { %235 = vadd.xlane.f32.xlu0 %v234_v1 }
 0x1f3   :  { %v239_v22 = vpop.xlane.xlu2 %238 }
 0x1f4   :  { %v241_v28 = vsub.f32 %v223_v25, %v239_v22 }
 0x1f6   :  { %v244_v34 = vsel %vm242_vm12, %v241_v28, 0.0 }
 0x229   :  { %v292_v3 = vpop.trf.xlu0 }
 0x22a   :  { %277 = vmatmul.msk.bf16.vlgmr.msra.gmra.mxu0 %vm116_vm11, %v292_v3 }
 0x231   :  { %v293_v2 = vpop.trf.xlu0 }
 0x232   :  { %278 = vmatmul.msk.bf16.vlgmr.msra.gmra.mxu1 %vm116_vm11, %v293_v2 }
 0x261   :  { %v236_v18 = vpop.xlane.xlu0 %235 }
 0x262   :  { %v240_v26 = vsub.f32 %v222_v19, %v236_v18 }
 0x264   :  { %v243_v32 = vsel %vm242_vm12, %v240_v26, 0.0 }
 0x265   :  { %v245_v36 = vadd.f32 %v244_v34, %v243_v32 }
 0x2a7   :  { %v133_v9 = vpop.f32.mrf.mxu0 }
 0x2a8   :  { %v138_v14 = vmul.f32 %v133_v9, %v36_v11 }
 0x2aa   :  { %v140_v20 = vsel %vm42_vm0, %v138_v14, 0.0 }
 0x2af   :  { %v135_v0 = vpop.f32.mrf.mxu0  ;;  %v185_v15 = vpop.f32.mrf.mxu1 }
 0x2b0   :  { %v139_v17 = vmul.f32 %v135_v0, %v37_v13  ;;  %v190_v29 = vmul.f32 %v185_v15, %v38_v23 }
 0x2b2   :  { %v141_v21 = vsel %vm42_vm0, %v139_v17, 0.0  ;;  %v192_v7 = vsel %vm42_vm0, %v190_v29, 0.0 }
 0x2b3   :  { %v142_v24 = vadd.f32 %v141_v21, %v140_v20 }
 0x2b5   :  { %143 = vadd.xlane.f32.xlu1 %v142_v24 }
 0x2b7   :  { %v187_v30 = vpop.f32.mrf.mxu1 }
 0x2b8   :  { %v191_v31 = vmul.f32 %v187_v30, %v39_v27 }
 0x2ba   :  { %v193_v33 = vsel %vm42_vm0, %v191_v31, 0.0 }
 0x2bb   :  { %v194_v35 = vadd.f32 %v193_v33, %v192_v7 }
 0x2bd   :  { %195 = vadd.xlane.f32.xlu2 %v194_v35  ;;  %246 = vadd.xlane.f32.xlu1 %v245_v36 }
 0x328   :  { %v144_v37 = vpop.xlane.xlu1 %143 }
 0x329   :  { %v145_v12 = vrot.slane %v144_v37, 4 }
 0x32b   :  { %v146_v38 = vadd.f32 %v145_v12, %v144_v37 }
 0x32d   :  { %v147_v39 = vrot.slane %v146_v38, 2 }
 0x32f   :  { %v148_v40 = vadd.f32 %v147_v39, %v146_v38 }
 0x330   :  { %v247_v41 = vpop.xlane.xlu1 %246  ;;  %v196_v42 = vpop.xlane.xlu2 %195 }
 0x331   :  { %v248_v43 = vrot.slane %v247_v41, 4  ;;  %v197_v44 = vrot.slane %v196_v42, 4  ;;  %v149_v45 = vrot.slane %v148_v40, 1 }
 0x333   :  { %v249_v46 = vadd.f32 %v248_v43, %v247_v41  ;;  %v198_v47 = vadd.f32 %v197_v44, %v196_v42  ;;  %v150_v48 = vadd.f32 %v149_v45, %v148_v40 }
 0x335   :  { %v250_v49 = vrot.slane %v249_v46, 2  ;;  %v199_v50 = vrot.slane %v198_v47, 2  ;;  %279 = vpush %v150_v48 }
 0x337   :  { %v251_v51 = vadd.f32 %v250_v49, %v249_v46  ;;  %v200_v52 = vadd.f32 %v199_v50, %v198_v47 }
 0x339   :  { %v201_v53 = vrot.slane %v200_v52, 1  ;;  %v252_v54 = vrot.slane %v251_v51, 1 }
 0x33b   :  { %v202_v55 = vadd.f32 %v201_v53, %v200_v52  ;;  %v253_v56 = vadd.f32 %v252_v54, %v251_v51 }
 0x33d   :  { %281 = vpush %v202_v55 }
 0x33e   :  { %283 = vpush %v253_v56 }
 0x366   :  { %s280_s1 = spop %279 }
 0x367   :  { %s152_s28 = sand.u32 2147483647, %s280_s1 }
 0x36e   :  { %s282_s29 = spop %281 }
 0x36f   :  { %s204_s30 = sand.u32 2147483647, %s282_s29  ;;  %s284_s4 = spop %283 }
 0x370   :  { %s205_s5 = sadd.f32 %s204_s30, %s152_s28 }
 0x371   :  { %258 = sst [smem:[#allocation5 + $0x1]] %s284_s4 }
 0x372   :  { %256 = sst [smem:[#allocation5]] %s205_s5 }
 0x373   :  { %267 = dma.smem_to_hbm %s350_s6, 16, %s265_s27, [#allocation4]  }
 0x374   :  { %343 = dma.done.wait [#allocation4], 16  }
 0x375   :  { %344 = vsyncadd [#allocation4], 4294967280 }
 0x376   :  { %272 = sfence }
 0x377   :  { %273 = vsyncpa [#allocation3], 1 }
 0x378   :  { %274 = vsyncpa [#allocation4], 1 }

</bundles_post_ra>
